<compile_context>
chip_gen: v6e
topology: v6e:2x2x1
jax: 0.10.0
libtpu: 0.0.40
codegen_flags: <defaults>
</compile_context>

<pallas_src>
import functools

import numpy as np
import jax
import jax.numpy as jnp
from jax import lax
from jax.experimental import pallas as pl
from jax.experimental.pallas import tpu as pltpu


MXU_DTYPE = jnp.bfloat16   # operands of the two conv matmuls; accumulation is f32


def _upsample_matrix(n_in, n_out):
    # PyTorch bilinear, align_corners=True: src = dst * (n_in-1)/(n_out-1)
    m = np.zeros((n_out, n_in), dtype=np.float32)
    if n_in == 1:
        m[:, 0] = 1.0
        return m
    scale = (n_in - 1) / (n_out - 1)
    for i in range(n_out):
        src = i * scale
        i0 = min(int(np.floor(src)), n_in - 1)
        frac = src - i0
        i1 = min(i0 + 1, n_in - 1)
        m[i, i0] += 1.0 - frac
        m[i, i1] += frac
    return m


# ---------------------------------------------------------------------------
# Kernel A: per-batch fused forward (down-conv, ReLU, separable upsample,
#           3x3 conv, per-batch BatchNorm partial sums).  Channel-major.
# ---------------------------------------------------------------------------
def _unet_fwd_kernel(p_ref, wd_ref, uhk_ref, uwt_ref, w9_ref,
                     xfv_ref, conv_ref, s_ref, ssq_ref,
                     *, c_inner, c_out, ho, wo, hp, wp, h2, w2):
    n = h2 * wp

    # (1) down conv: ONE matmul, K = 16*Cin (patches are pre-activated in the
    #     wrapper).  Output (Cinner, Ho*Wo) -> lane-dense store.
    xfv = jnp.dot(wd_ref[...], p_ref[0], preferred_element_type=jnp.float32)
    xfv_ref[0] = xfv

    # (2) ReLU (start of the up path)
    xr = jnp.maximum(xfv, 0.0)

    # (3) relayout (Cinner, Ho*Wo) -> (Ho*Cinner, Wo), rows ordered (ho, c)
    xr_hc = jnp.concatenate(
        [xr[:, i * wo:(i + 1) * wo] for i in range(ho)], axis=0)

    # (4) separable bilinear x2 upsample with the 3x3 conv's zero-pad folded in:
    #     H-step via kron(uh_pad, I_C), then W-step via uw_pad^T.  f32 (tiny).
    yh = jnp.dot(uhk_ref[...], xr_hc, preferred_element_type=jnp.float32)   # (Hp*C, Wo)
    yw = jnp.dot(yh, uwt_ref[...], preferred_element_type=jnp.float32)      # (Hp*C, Wp)

    # (5) relayout rows=(hp, c) -> flattened padded plane (Cinner, Hp*Wp [+Wp]),
    #     one bf16 cast for the slab.
    pieces = [yw[i * c_inner:(i + 1) * c_inner, :] for i in range(hp)]
    pieces.append(jnp.zeros((c_inner, wp), jnp.float32))     # slack for the last taps
    y_flat = jnp.concatenate(pieces, axis=1).astype(MXU_DTYPE)

    # (6) 3x3 conv: 9-tap slab (static lane slices of the flat plane) stacked on
    #     the K axis -> ONE dense matmul with K = 9*Cinner, lane-dense output.
    slab = jnp.concatenate(
        [y_flat[:, kh * wp + kw: kh * wp + kw + n]
         for kh in range(3) for kw in range(3)], axis=0)                    # (9*C, n)
    conv = jnp.dot(w9_ref[...], slab, preferred_element_type=jnp.float32)   # (Cout, n)
    conv_ref[0] = conv

    # (7) per-batch BatchNorm partial sums; wrap columns (q >= W2 of the
    #     flat-conv trick) masked out via an in-kernel iota mask (no DMA'd mask).
    base = (lax.broadcasted_iota(jnp.int32, (c_out, wp), 1) < w2).astype(jnp.float32)
    maskf = jnp.concatenate([base] * h2, axis=1)                            # (Cout, n)
    cm = conv * maskf
    s_ref[0] = jnp.sum(cm, axis=1, keepdims=True)
    ssq_ref[0] = jnp.sum(cm * cm, axis=1, keepdims=True)


# ---------------------------------------------------------------------------
# Kernel B: BatchNorm affine apply + wrap-column drop, emitting the final
#           lane-dense (Cout, H2*W2) layout (free reshape to NCHW outside).
# ---------------------------------------------------------------------------
def _bn_layout_kernel(conv_ref, scale_ref, shift_ref, o_ref, *, h2, w2, wp):
    a = conv_ref[0] * scale_ref[...] + shift_ref[...]          # (Cout, n)
    dense = jnp.concatenate(
        [a[:, r * wp: r * wp + w2] for r in range(h2)], axis=1)  # drop wrap cols
    o_ref[0] = dense                                            # (Cout, H2*W2)


# ---------------------------------------------------------------------------
# Wrapper: NCHW in / NCHW out (PyTorch convention); channel-major inside.
# ---------------------------------------------------------------------------
def unet_innermost_forward(x_nchw, w_down, w_up, gamma, beta, *, eps=1e-5):
    B, c_in, H, W = x_nchw.shape
    c_inner = w_down.shape[0]
    c_out = w_up.shape[0]
    assert H % 2 == 0 and W % 2 == 0, "even spatial dims required (stride-2 down conv)"
    Ho, Wo = H // 2, W // 2
    H2, W2 = 2 * Ho, 2 * Wo
    Hp, Wp = H2 + 2, W2 + 2          # upsampled plane incl. the 3x3 conv's zero pad
    n = H2 * Wp                      # flat-conv rows (incl. masked wrap columns)
    f32 = jnp.float32

    # ---- skip activation once (inplace LeakyReLU semantics); feeds both the
    #      im2col patches and the final channel concat.
    x_act = jnp.where(x_nchw > 0, x_nchw, 0.2 * x_nchw)

    # ---- im2col patches for the 4x4/stride-2/pad-1 conv, channel-major,
    #      K ordered (ci, kh, kw) to match w_down.reshape(Cinner, Cin*16).
    xp = jnp.pad(x_act, ((0, 0), (0, 0), (1, 1), (1, 1)))
    taps = jnp.stack(
        [xp[:, :, kh:kh + 2 * Ho:2, kw:kw + 2 * Wo:2]
         for kh in range(4) for kw in range(4)], axis=2)        # (B, Cin, 16, Ho, Wo)
    patches = taps.reshape(B, c_in * 16, Ho * Wo).astype(MXU_DTYPE)

    # ---- packed weights / constant matrices
    wd = w_down.reshape(c_inner, c_in * 16).astype(MXU_DTYPE)
    w9 = jnp.transpose(w_up, (0, 2, 3, 1)).reshape(c_out, 9 * c_inner).astype(MXU_DTYPE)

    uh = np.zeros((Hp, Ho), np.float32)
    uh[1:-1] = _upsample_matrix(Ho, H2)
    uw = np.zeros((Wp, Wo), np.float32)
    uw[1:-1] = _upsample_matrix(Wo, W2)
    uhk = jnp.asarray(np.kron(uh, np.eye(c_inner, dtype=np.float32)))  # (Hp*C, Ho*C)
    uwt = jnp.asarray(uw.T)                                            # (Wo, Wp)

    # ---- kernel A: batch-parallel fused forward --------------------------------
    # NOTE: at realistic spatial sizes re-check the VMEM budget (conv block is the
    # largest per-step buffer); vmem_limit_bytes can be raised via CompilerParams.
    kern_a = functools.partial(_unet_fwd_kernel, c_inner=c_inner, c_out=c_out,
                               ho=Ho, wo=Wo, hp=Hp, wp=Wp, h2=H2, w2=W2)
    xfv, conv_pre, s_p, ssq_p = pl.pallas_call(
        kern_a,
        grid=(B,),
        in_specs=[
            pl.BlockSpec((1, c_in * 16, Ho * Wo), lambda i: (i, 0, 0)),
            pl.BlockSpec((c_inner, c_in * 16), lambda i: (0, 0)),
            pl.BlockSpec((Hp * c_inner, Ho * c_inner), lambda i: (0, 0)),
            pl.BlockSpec((Wo, Wp), lambda i: (0, 0)),
            pl.BlockSpec((c_out, 9 * c_inner), lambda i: (0, 0)),
        ],
        out_specs=[
            pl.BlockSpec((1, c_inner, Ho * Wo), lambda i: (i, 0, 0)),
            pl.BlockSpec((1, c_out, n), lambda i: (i, 0, 0)),
            pl.BlockSpec((1, c_out, 1), lambda i: (i, 0, 0)),
            pl.BlockSpec((1, c_out, 1), lambda i: (i, 0, 0)),
        ],
        out_shape=[
            jax.ShapeDtypeStruct((B, c_inner, Ho * Wo), f32),
            jax.ShapeDtypeStruct((B, c_out, n), f32),
            jax.ShapeDtypeStruct((B, c_out, 1), f32),
            jax.ShapeDtypeStruct((B, c_out, 1), f32),
        ],
        compiler_params=pltpu.CompilerParams(dimension_semantics=("parallel",)),
    )(patches, wd, uhk, uwt, w9)

    # ---- BatchNorm statistics finalize: done ONCE in XLA on the tiny partials ---
    count = float(B * H2 * W2)
    s_tot = jnp.sum(s_p[:, :, 0], axis=0)                      # (Cout,)
    ssq_tot = jnp.sum(ssq_p[:, :, 0], axis=0)
    mean = s_tot / count
    var = jnp.maximum(ssq_tot / count - mean * mean, 0.0)      # clamp: no rsqrt(<0)
    scale = (gamma.astype(f32) * lax.rsqrt(var + eps)).reshape(c_out, 1)
    shift = (beta.astype(f32) - mean * scale[:, 0]).reshape(c_out, 1)

    # ---- kernel B: affine apply + wrap-column drop, lane-dense final layout -----
    kern_b = functools.partial(_bn_layout_kernel, h2=H2, w2=W2, wp=Wp)
    up_dense = pl.pallas_call(
        kern_b,
        grid=(B,),
        in_specs=[
            pl.BlockSpec((1, c_out, n), lambda i: (i, 0, 0)),
            pl.BlockSpec((c_out, 1), lambda i: (0, 0)),
            pl.BlockSpec((c_out, 1), lambda i: (0, 0)),
        ],
        out_specs=pl.BlockSpec((1, c_out, H2 * W2), lambda i: (i, 0, 0)),
        out_shape=jax.ShapeDtypeStruct((B, c_out, H2 * W2), f32),
        compiler_params=pltpu.CompilerParams(dimension_semantics=("parallel",)),
    )(conv_pre, scale, shift)

    # ---- output layout: free reshapes only (no transposes) ----------------------
    x_up = up_dense.reshape(B, c_out, H2, W2)
    x_fv = xfv.reshape(B, c_inner, Ho, Wo)
    out = jnp.concatenate([x_up, x_act], axis=1)   # skip is leaky_relu(x_orig), as in reference
    return out, x_fv


# ---------------------------------------------------------------------------
# Pure-JAX f32 reference (for the correctness check in __main__).
# ---------------------------------------------------------------------------
def _reference(x, w_down, w_up, gamma, beta, eps=1e-5):
    B, c_in, H, W = x.shape
    Ho, Wo = H // 2, W // 2
    H2, W2 = 2 * Ho, 2 * Wo
    dn = ('NCHW', 'OIHW', 'NCHW')
    x_act = jnp.where(x > 0, x, 0.2 * x)
    x_fv = lax.conv_general_dilated(x_act, w_down, (2, 2), [(1, 1), (1, 1)],
                                    dimension_numbers=dn,
                                    precision=lax.Precision.HIGHEST)
    xr = jnp.maximum(x_fv, 0.0)
    uh = jnp.asarray(_upsample_matrix(Ho, H2))
    uw = jnp.asarray(_upsample_matrix(Wo, W2))
    y = jnp.einsum('ph,bchw,qw->bcpq', uh, xr, uw, precision=lax.Precision.HIGHEST)
    conv = lax.conv_general_dilated(y, w_up, (1, 1), [(1, 1), (1, 1)],
                                    dimension_numbers=dn,
                                    precision=lax.Precision.HIGHEST)
    mean = jnp.mean(conv, axis=(0, 2, 3), keepdims=True)
    var = jnp.mean((conv - mean) ** 2, axis=(0, 2, 3), keepdims=True)
    bn = (conv - mean) * (gamma.reshape(1, -1, 1, 1) * lax.rsqrt(var + eps)) \
        + beta.reshape(1, -1, 1, 1)
    return jnp.concatenate([bn, x_act], axis=1), x_fv


if __name__ == "__main__":
    B, H, W = 2, 16, 16
    outer_nc, inner_nc = 4, 8
    input_nc = outer_nc  # module default: input_nc = outer_nc when None

    key = jax.random.PRNGKey(0)
    k1, k2, k3, k4, k5 = jax.random.split(key, 5)
    w_down = 0.1 * jax.random.normal(k1, (inner_nc, input_nc, 4, 4), jnp.float32)
    w_up = 0.1 * jax.random.normal(k2, (outer_nc, inner_nc, 3, 3), jnp.float32)
    gamma = 1.0 + 0.1 * jax.random.normal(k3, (outer_nc,), jnp.float32)
    beta = 0.1 * jax.random.normal(k4, (outer_nc,), jnp.float32)
    x = jax.random.normal(k5, (B, input_nc, H, W), jnp.float32)

    fwd = jax.jit(unet_innermost_forward)
    out, x_fv = fwd(x, w_down, w_up, gamma, beta)
    jax.block_until_ready((out, x_fv))

    assert out.shape == (B, outer_nc + input_nc, H, W)
    assert x_fv.shape == (B, inner_nc, H // 2, W // 2)
    assert bool(jnp.all(jnp.isfinite(out))) and bool(jnp.all(jnp.isfinite(x_fv)))

    ref_out, ref_fv = _reference(x, w_down, w_up, gamma, beta)
    np.testing.assert_allclose(np.asarray(x_fv), np.asarray(ref_fv), rtol=0.05, atol=0.02)
    np.testing.assert_allclose(np.asarray(out), np.asarray(ref_out), rtol=0.05, atol=0.10)

    print("KERNEL_OK")
</pallas_src>

<mosaic_0001>
module attributes {stable_mosaic.version = 11 : i64} {
  func.func @_unet_fwd_kernel(%arg0: i32, %arg1: memref<1x64x64xbf16, #tpu.memory_space<vmem>>, %arg2: memref<8x64xbf16, #tpu.memory_space<vmem>>, %arg3: memref<144x64xf32, #tpu.memory_space<vmem>>, %arg4: memref<8x18xf32, #tpu.memory_space<vmem>>, %arg5: memref<4x72xbf16, #tpu.memory_space<vmem>>, %arg6: memref<1x8x64xf32, #tpu.memory_space<vmem>>, %arg7: memref<1x4x288xf32, #tpu.memory_space<vmem>>, %arg8: memref<1x4x1xf32, #tpu.memory_space<vmem>>, %arg9: memref<1x4x1xf32, #tpu.memory_space<vmem>>) attributes {dimension_semantics = [#tpu.dimension_semantics<parallel>], iteration_bounds = array<i64: 2>, scalar_prefetch = 0 : i64, scratch_operands = 0 : i64, tpu.core_type = #tpu.core_type<tc>, window_params = [{transform_indices = @transform_0, window_bounds = array<i64: 1, 64, 64>}, {pipeline_mode = #tpu.pipeline_mode<synchronous>, transform_indices = @transform_1, window_bounds = array<i64: 8, 64>}, {pipeline_mode = #tpu.pipeline_mode<synchronous>, transform_indices = @transform_2, window_bounds = array<i64: 144, 64>}, {pipeline_mode = #tpu.pipeline_mode<synchronous>, transform_indices = @transform_3, window_bounds = array<i64: 8, 18>}, {pipeline_mode = #tpu.pipeline_mode<synchronous>, transform_indices = @transform_4, window_bounds = array<i64: 4, 72>}, {transform_indices = @transform_5, window_bounds = array<i64: 1, 8, 64>}, {transform_indices = @transform_6, window_bounds = array<i64: 1, 4, 288>}, {transform_indices = @transform_7, window_bounds = array<i64: 1, 4, 1>}, {transform_indices = @transform_8, window_bounds = array<i64: 1, 4, 1>}]} {
    %c0 = arith.constant 0 : index
    %c0_0 = arith.constant 0 : index
    %0 = vector.load %arg2[%c0, %c0_0] : memref<8x64xbf16, #tpu.memory_space<vmem>>, vector<8x64xbf16>
    %c0_1 = arith.constant 0 : index
    %c0_2 = arith.constant 0 : index
    %c0_3 = arith.constant 0 : index
    %1 = vector.load %arg1[%c0_1, %c0_2, %c0_3] : memref<1x64x64xbf16, #tpu.memory_space<vmem>>, vector<1x64x64xbf16>
    %2 = vector.shape_cast %1 : vector<1x64x64xbf16> to vector<64x64xbf16>
    %cst = arith.constant dense<0.000000e+00> : vector<8x64xf32>
    %3 = tpu.matmul %0, %2, %cst {dimension_numbers = #tpu.dot_dimension_numbers<[1], [0], [0], [1], [0, 0, 1, 1], [], []>} : vector<8x64xbf16>, vector<64x64xbf16>, vector<8x64xf32> -> vector<8x64xf32>
    %c0_4 = arith.constant 0 : index
    %c0_5 = arith.constant 0 : index
    %c0_6 = arith.constant 0 : index
    %4 = vector.load %arg6[%c0_4, %c0_5, %c0_6] : memref<1x8x64xf32, #tpu.memory_space<vmem>>, vector<1x8x64xf32>
    %5 = vector.shape_cast %4 : vector<1x8x64xf32> to vector<8x64xf32>
    %6 = vector.shape_cast %3 : vector<8x64xf32> to vector<1x8x64xf32>
    tpu.vector_store %arg6[%c0_4, %c0_5, %c0_6], %6 {strides = array<i32>} : memref<1x8x64xf32, #tpu.memory_space<vmem>>, vector<1x8x64xf32>,
    %cst_7 = arith.constant 0.000000e+00 : f32
    %7 = vector.broadcast %cst_7 : f32 to vector<8x64xf32>
    %8 = arith.maximumf %3, %7 : vector<8x64xf32>
    %9 = vector.extract_strided_slice %8 {offsets = [0, 0], sizes = [8, 8], strides = [1, 1]} : vector<8x64xf32> to vector<8x8xf32>
    %10 = vector.extract_strided_slice %8 {offsets = [0, 8], sizes = [8, 8], strides = [1, 1]} : vector<8x64xf32> to vector<8x8xf32>
    %11 = vector.extract_strided_slice %8 {offsets = [0, 16], sizes = [8, 8], strides = [1, 1]} : vector<8x64xf32> to vector<8x8xf32>
    %12 = vector.extract_strided_slice %8 {offsets = [0, 24], sizes = [8, 8], strides = [1, 1]} : vector<8x64xf32> to vector<8x8xf32>
    %13 = vector.extract_strided_slice %8 {offsets = [0, 32], sizes = [8, 8], strides = [1, 1]} : vector<8x64xf32> to vector<8x8xf32>
    %14 = vector.extract_strided_slice %8 {offsets = [0, 40], sizes = [8, 8], strides = [1, 1]} : vector<8x64xf32> to vector<8x8xf32>
    %15 = vector.extract_strided_slice %8 {offsets = [0, 48], sizes = [8, 8], strides = [1, 1]} : vector<8x64xf32> to vector<8x8xf32>
    %16 = vector.extract_strided_slice %8 {offsets = [0, 56], sizes = [8, 8], strides = [1, 1]} : vector<8x64xf32> to vector<8x8xf32>
    %17 = tpu.concatenate %9, %10, %11, %12, %13, %14, %15, %16 in 0 : vector<8x8xf32>, vector<8x8xf32>, vector<8x8xf32>, vector<8x8xf32>, vector<8x8xf32>, vector<8x8xf32>, vector<8x8xf32>, vector<8x8xf32> -> vector<64x8xf32>
    %c0_8 = arith.constant 0 : index
    %c0_9 = arith.constant 0 : index
    %18 = vector.load %arg3[%c0_8, %c0_9] : memref<144x64xf32, #tpu.memory_space<vmem>>, vector<144x64xf32>
    %cst_10 = arith.constant dense<0.000000e+00> : vector<144x8xf32>
    %19 = tpu.matmul %18, %17, %cst_10 {dimension_numbers = #tpu.dot_dimension_numbers<[1], [0], [0], [1], [0, 0, 1, 1], [], []>} : vector<144x64xf32>, vector<64x8xf32>, vector<144x8xf32> -> vector<144x8xf32>
    %c0_11 = arith.constant 0 : index
    %c0_12 = arith.constant 0 : index
    %20 = vector.load %arg4[%c0_11, %c0_12] : memref<8x18xf32, #tpu.memory_space<vmem>>, vector<8x18xf32>
    %cst_13 = arith.constant dense<0.000000e+00> : vector<144x18xf32>
    %21 = tpu.matmul %19, %20, %cst_13 {dimension_numbers = #tpu.dot_dimension_numbers<[1], [0], [0], [1], [0, 0, 1, 1], [], []>} : vector<144x8xf32>, vector<8x18xf32>, vector<144x18xf32> -> vector<144x18xf32>
    %22 = vector.extract_strided_slice %21 {offsets = [0, 0], sizes = [8, 18], strides = [1, 1]} : vector<144x18xf32> to vector<8x18xf32>
    %23 = vector.extract_strided_slice %21 {offsets = [8, 0], sizes = [8, 18], strides = [1, 1]} : vector<144x18xf32> to vector<8x18xf32>
    %24 = vector.extract_strided_slice %21 {offsets = [16, 0], sizes = [8, 18], strides = [1, 1]} : vector<144x18xf32> to vector<8x18xf32>
    %25 = vector.extract_strided_slice %21 {offsets = [24, 0], sizes = [8, 18], strides = [1, 1]} : vector<144x18xf32> to vector<8x18xf32>
    %26 = vector.extract_strided_slice %21 {offsets = [32, 0], sizes = [8, 18], strides = [1, 1]} : vector<144x18xf32> to vector<8x18xf32>
    %27 = vector.extract_strided_slice %21 {offsets = [40, 0], sizes = [8, 18], strides = [1, 1]} : vector<144x18xf32> to vector<8x18xf32>
    %28 = vector.extract_strided_slice %21 {offsets = [48, 0], sizes = [8, 18], strides = [1, 1]} : vector<144x18xf32> to vector<8x18xf32>
    %29 = vector.extract_strided_slice %21 {offsets = [56, 0], sizes = [8, 18], strides = [1, 1]} : vector<144x18xf32> to vector<8x18xf32>
    %30 = vector.extract_strided_slice %21 {offsets = [64, 0], sizes = [8, 18], strides = [1, 1]} : vector<144x18xf32> to vector<8x18xf32>
    %31 = vector.extract_strided_slice %21 {offsets = [72, 0], sizes = [8, 18], strides = [1, 1]} : vector<144x18xf32> to vector<8x18xf32>
    %32 = vector.extract_strided_slice %21 {offsets = [80, 0], sizes = [8, 18], strides = [1, 1]} : vector<144x18xf32> to vector<8x18xf32>
    %33 = vector.extract_strided_slice %21 {offsets = [88, 0], sizes = [8, 18], strides = [1, 1]} : vector<144x18xf32> to vector<8x18xf32>
    %34 = vector.extract_strided_slice %21 {offsets = [96, 0], sizes = [8, 18], strides = [1, 1]} : vector<144x18xf32> to vector<8x18xf32>
    %35 = vector.extract_strided_slice %21 {offsets = [104, 0], sizes = [8, 18], strides = [1, 1]} : vector<144x18xf32> to vector<8x18xf32>
    %36 = vector.extract_strided_slice %21 {offsets = [112, 0], sizes = [8, 18], strides = [1, 1]} : vector<144x18xf32> to vector<8x18xf32>
    %37 = vector.extract_strided_slice %21 {offsets = [120, 0], sizes = [8, 18], strides = [1, 1]} : vector<144x18xf32> to vector<8x18xf32>
    %38 = vector.extract_strided_slice %21 {offsets = [128, 0], sizes = [8, 18], strides = [1, 1]} : vector<144x18xf32> to vector<8x18xf32>
    %39 = vector.extract_strided_slice %21 {offsets = [136, 0], sizes = [8, 18], strides = [1, 1]} : vector<144x18xf32> to vector<8x18xf32>
    %cst_14 = arith.constant 0.000000e+00 : f32
    %40 = vector.broadcast %cst_14 : f32 to vector<8x18xf32>
    %41 = tpu.concatenate %22, %23, %24, %25, %26, %27, %28, %29, %30, %31, %32, %33, %34, %35, %36, %37 in 1 : vector<8x18xf32>, vector<8x18xf32>, vector<8x18xf32>, vector<8x18xf32>, vector<8x18xf32>, vector<8x18xf32>, vector<8x18xf32>, vector<8x18xf32>, vector<8x18xf32>, vector<8x18xf32>, vector<8x18xf32>, vector<8x18xf32>, vector<8x18xf32>, vector<8x18xf32>, vector<8x18xf32>, vector<8x18xf32> -> vector<8x288xf32>
    %42 = tpu.concatenate %38, %39, %40 in 1 : vector<8x18xf32>, vector<8x18xf32>, vector<8x18xf32> -> vector<8x54xf32>
    %43 = tpu.concatenate %41, %42 in 1 : vector<8x288xf32>, vector<8x54xf32> -> vector<8x342xf32>
    %44 = arith.truncf %43 : vector<8x342xf32> to vector<8x342xbf16>
    %45 = vector.extract_strided_slice %44 {offsets = [0, 0], sizes = [8, 288], strides = [1, 1]} : vector<8x342xbf16> to vector<8x288xbf16>
    %46 = vector.extract_strided_slice %44 {offsets = [0, 1], sizes = [8, 288], strides = [1, 1]} : vector<8x342xbf16> to vector<8x288xbf16>
    %47 = vector.extract_strided_slice %44 {offsets = [0, 2], sizes = [8, 288], strides = [1, 1]} : vector<8x342xbf16> to vector<8x288xbf16>
    %48 = vector.extract_strided_slice %44 {offsets = [0, 18], sizes = [8, 288], strides = [1, 1]} : vector<8x342xbf16> to vector<8x288xbf16>
    %49 = vector.extract_strided_slice %44 {offsets = [0, 19], sizes = [8, 288], strides = [1, 1]} : vector<8x342xbf16> to vector<8x288xbf16>
    %50 = vector.extract_strided_slice %44 {offsets = [0, 20], sizes = [8, 288], strides = [1, 1]} : vector<8x342xbf16> to vector<8x288xbf16>
    %51 = vector.extract_strided_slice %44 {offsets = [0, 36], sizes = [8, 288], strides = [1, 1]} : vector<8x342xbf16> to vector<8x288xbf16>
    %52 = vector.extract_strided_slice %44 {offsets = [0, 37], sizes = [8, 288], strides = [1, 1]} : vector<8x342xbf16> to vector<8x288xbf16>
    %53 = vector.extract_strided_slice %44 {offsets = [0, 38], sizes = [8, 288], strides = [1, 1]} : vector<8x342xbf16> to vector<8x288xbf16>
    %54 = tpu.concatenate %45, %46, %47, %48, %49, %50, %51, %52, %53 in 0 : vector<8x288xbf16>, vector<8x288xbf16>, vector<8x288xbf16>, vector<8x288xbf16>, vector<8x288xbf16>, vector<8x288xbf16>, vector<8x288xbf16>, vector<8x288xbf16>, vector<8x288xbf16> -> vector<72x288xbf16>
    %c0_15 = arith.constant 0 : index
    %c0_16 = arith.constant 0 : index
    %55 = vector.load %arg5[%c0_15, %c0_16] : memref<4x72xbf16, #tpu.memory_space<vmem>>, vector<4x72xbf16>
    %cst_17 = arith.constant dense<0.000000e+00> : vector<4x288xf32>
    %56 = tpu.matmul %55, %54, %cst_17 {dimension_numbers = #tpu.dot_dimension_numbers<[1], [0], [0], [1], [0, 0, 1, 1], [], []>} : vector<4x72xbf16>, vector<72x288xbf16>, vector<4x288xf32> -> vector<4x288xf32>
    %c0_18 = arith.constant 0 : index
    %c0_19 = arith.constant 0 : index
    %c0_20 = arith.constant 0 : index
    %57 = vector.load %arg7[%c0_18, %c0_19, %c0_20] : memref<1x4x288xf32, #tpu.memory_space<vmem>>, vector<1x4x288xf32>
    %58 = vector.shape_cast %57 : vector<1x4x288xf32> to vector<4x288xf32>
    %59 = vector.shape_cast %56 : vector<4x288xf32> to vector<1x4x288xf32>
    tpu.vector_store %arg7[%c0_18, %c0_19, %c0_20], %59 {strides = array<i32>} : memref<1x4x288xf32, #tpu.memory_space<vmem>>, vector<1x4x288xf32>,
    %60 = tpu.iota {dimensions = array<i32: 1>} : vector<4x18xi32>
    %c16_i32 = arith.constant 16 : i32
    %61 = vector.broadcast %c16_i32 : i32 to vector<4x18xi32>
    %62 = arith.cmpi slt, %60, %61 : vector<4x18xi32>
    %63 = arith.extui %62 : vector<4x18xi1> to vector<4x18xi32>
    %64 = arith.sitofp %63 : vector<4x18xi32> to vector<4x18xf32>
    %65 = tpu.concatenate %64, %64, %64, %64, %64, %64, %64, %64, %64, %64, %64, %64, %64, %64, %64, %64 in 1 : vector<4x18xf32>, vector<4x18xf32>, vector<4x18xf32>, vector<4x18xf32>, vector<4x18xf32>, vector<4x18xf32>, vector<4x18xf32>, vector<4x18xf32>, vector<4x18xf32>, vector<4x18xf32>, vector<4x18xf32>, vector<4x18xf32>, vector<4x18xf32>, vector<4x18xf32>, vector<4x18xf32>, vector<4x18xf32> -> vector<4x288xf32>
    %66 = arith.mulf %56, %65 : vector<4x288xf32>
    %cst_21 = arith.constant dense<0.000000e+00> : vector<4xf32>
    %67 = vector.multi_reduction <add>, %66, %cst_21 [1] : vector<4x288xf32> to vector<4xf32>
    %68 = vector.shape_cast %67 : vector<4xf32> to vector<4x1xf32>
    %c0_22 = arith.constant 0 : index
    %c0_23 = arith.constant 0 : index
    %c0_24 = arith.constant 0 : index
    %69 = vector.load %arg8[%c0_22, %c0_23, %c0_24] : memref<1x4x1xf32, #tpu.memory_space<vmem>>, vector<1x4x1xf32>
    %70 = vector.shape_cast %69 : vector<1x4x1xf32> to vector<4x1xf32>
    %71 = vector.shape_cast %68 : vector<4x1xf32> to vector<1x4x1xf32>
    tpu.vector_store %arg8[%c0_22, %c0_23, %c0_24], %71 {strides = array<i32>} : memref<1x4x1xf32, #tpu.memory_space<vmem>>, vector<1x4x1xf32>,
    %72 = arith.mulf %66, %66 : vector<4x288xf32>
    %cst_25 = arith.constant dense<0.000000e+00> : vector<4xf32>
    %73 = vector.multi_reduction <add>, %72, %cst_25 [1] : vector<4x288xf32> to vector<4xf32>
    %74 = vector.shape_cast %73 : vector<4xf32> to vector<4x1xf32>
    %c0_26 = arith.constant 0 : index
    %c0_27 = arith.constant 0 : index
    %c0_28 = arith.constant 0 : index
    %75 = vector.load %arg9[%c0_26, %c0_27, %c0_28] : memref<1x4x1xf32, #tpu.memory_space<vmem>>, vector<1x4x1xf32>
    %76 = vector.shape_cast %75 : vector<1x4x1xf32> to vector<4x1xf32>
    %77 = vector.shape_cast %74 : vector<4x1xf32> to vector<1x4x1xf32>
    tpu.vector_store %arg9[%c0_26, %c0_27, %c0_28], %77 {strides = array<i32>} : memref<1x4x1xf32, #tpu.memory_space<vmem>>, vector<1x4x1xf32>,
    return
  }
  func.func @transform_0(%arg0: i32) -> (i32, i32, i32) {
    %c0_i32 = arith.constant 0 : i32
    %c0_i32_0 = arith.constant 0 : i32
    %c0_i32_1 = arith.constant 0 : i32
    return %arg0, %c0_i32, %c0_i32_0 : i32, i32, i32
  }
  func.func @transform_1(%arg0: i32) -> (i32, i32) {
    %c0_i32 = arith.constant 0 : i32
    %c0_i32_0 = arith.constant 0 : i32
    %c0_i32_1 = arith.constant 0 : i32
    return %c0_i32, %c0_i32_0 : i32, i32
  }
  func.func @transform_2(%arg0: i32) -> (i32, i32) {
    %c0_i32 = arith.constant 0 : i32
    %c0_i32_0 = arith.constant 0 : i32
    %c0_i32_1 = arith.constant 0 : i32
    return %c0_i32, %c0_i32_0 : i32, i32
  }
  func.func @transform_3(%arg0: i32) -> (i32, i32) {
    %c0_i32 = arith.constant 0 : i32
    %c0_i32_0 = arith.constant 0 : i32
    %c0_i32_1 = arith.constant 0 : i32
    return %c0_i32, %c0_i32_0 : i32, i32
  }
  func.func @transform_4(%arg0: i32) -> (i32, i32) {
    %c0_i32 = arith.constant 0 : i32
    %c0_i32_0 = arith.constant 0 : i32
    %c0_i32_1 = arith.constant 0 : i32
    return %c0_i32, %c0_i32_0 : i32, i32
  }
  func.func @transform_5(%arg0: i32) -> (i32, i32, i32) {
    %c0_i32 = arith.constant 0 : i32
    %c0_i32_0 = arith.constant 0 : i32
    %c0_i32_1 = arith.constant 0 : i32
    return %arg0, %c0_i32, %c0_i32_0 : i32, i32, i32
  }
  func.func @transform_6(%arg0: i32) -> (i32, i32, i32) {
    %c0_i32 = arith.constant 0 : i32
    %c0_i32_0 = arith.constant 0 : i32
    %c0_i32_1 = arith.constant 0 : i32
    return %arg0, %c0_i32, %c0_i32_0 : i32, i32, i32
  }
  func.func @transform_7(%arg0: i32) -> (i32, i32, i32) {
    %c0_i32 = arith.constant 0 : i32
    %c0_i32_0 = arith.constant 0 : i32
    %c0_i32_1 = arith.constant 0 : i32
    return %arg0, %c0_i32, %c0_i32_0 : i32, i32, i32
  }
  func.func @transform_8(%arg0: i32) -> (i32, i32, i32) {
    %c0_i32 = arith.constant 0 : i32
    %c0_i32_0 = arith.constant 0 : i32
    %c0_i32_1 = arith.constant 0 : i32
    return %arg0, %c0_i32, %c0_i32_0 : i32, i32, i32
  }
}

module attributes {stable_mosaic.version = 11 : i64} {
  func.func @_bn_layout_kernel(%arg0: i32, %arg1: memref<1x4x288xf32, #tpu.memory_space<vmem>>, %arg2: memref<4x1xf32, #tpu.memory_space<vmem>>, %arg3: memref<4x1xf32, #tpu.memory_space<vmem>>, %arg4: memref<1x4x256xf32, #tpu.memory_space<vmem>>) attributes {dimension_semantics = [#tpu.dimension_semantics<parallel>], iteration_bounds = array<i64: 2>, scalar_prefetch = 0 : i64, scratch_operands = 0 : i64, tpu.core_type = #tpu.core_type<tc>, window_params = [{transform_indices = @transform_0, window_bounds = array<i64: 1, 4, 288>}, {pipeline_mode = #tpu.pipeline_mode<synchronous>, transform_indices = @transform_1, window_bounds = array<i64: 4, 1>}, {pipeline_mode = #tpu.pipeline_mode<synchronous>, transform_indices = @transform_2, window_bounds = array<i64: 4, 1>}, {transform_indices = @transform_3, window_bounds = array<i64: 1, 4, 256>}]} {
    %c0 = arith.constant 0 : index
    %c0_0 = arith.constant 0 : index
    %c0_1 = arith.constant 0 : index
    %0 = vector.load %arg1[%c0, %c0_0, %c0_1] : memref<1x4x288xf32, #tpu.memory_space<vmem>>, vector<1x4x288xf32>
    %1 = vector.shape_cast %0 : vector<1x4x288xf32> to vector<4x288xf32>
    %c0_2 = arith.constant 0 : index
    %c0_3 = arith.constant 0 : index
    %2 = vector.load %arg2[%c0_2, %c0_3] : memref<4x1xf32, #tpu.memory_space<vmem>>, vector<4x1xf32>
    %3 = vector.broadcast %2 : vector<4x1xf32> to vector<4x288xf32>
    %4 = arith.mulf %1, %3 : vector<4x288xf32>
    %c0_4 = arith.constant 0 : index
    %c0_5 = arith.constant 0 : index
    %5 = vector.load %arg3[%c0_4, %c0_5] : memref<4x1xf32, #tpu.memory_space<vmem>>, vector<4x1xf32>
    %6 = vector.broadcast %5 : vector<4x1xf32> to vector<4x288xf32>
    %7 = arith.addf %4, %6 : vector<4x288xf32>
    %8 = vector.extract_strided_slice %7 {offsets = [0, 0], sizes = [4, 16], strides = [1, 1]} : vector<4x288xf32> to vector<4x16xf32>
    %9 = vector.extract_strided_slice %7 {offsets = [0, 18], sizes = [4, 16], strides = [1, 1]} : vector<4x288xf32> to vector<4x16xf32>
    %10 = vector.extract_strided_slice %7 {offsets = [0, 36], sizes = [4, 16], strides = [1, 1]} : vector<4x288xf32> to vector<4x16xf32>
    %11 = vector.extract_strided_slice %7 {offsets = [0, 54], sizes = [4, 16], strides = [1, 1]} : vector<4x288xf32> to vector<4x16xf32>
    %12 = vector.extract_strided_slice %7 {offsets = [0, 72], sizes = [4, 16], strides = [1, 1]} : vector<4x288xf32> to vector<4x16xf32>
    %13 = vector.extract_strided_slice %7 {offsets = [0, 90], sizes = [4, 16], strides = [1, 1]} : vector<4x288xf32> to vector<4x16xf32>
    %14 = vector.extract_strided_slice %7 {offsets = [0, 108], sizes = [4, 16], strides = [1, 1]} : vector<4x288xf32> to vector<4x16xf32>
    %15 = vector.extract_strided_slice %7 {offsets = [0, 126], sizes = [4, 16], strides = [1, 1]} : vector<4x288xf32> to vector<4x16xf32>
    %16 = vector.extract_strided_slice %7 {offsets = [0, 144], sizes = [4, 16], strides = [1, 1]} : vector<4x288xf32> to vector<4x16xf32>
    %17 = vector.extract_strided_slice %7 {offsets = [0, 162], sizes = [4, 16], strides = [1, 1]} : vector<4x288xf32> to vector<4x16xf32>
    %18 = vector.extract_strided_slice %7 {offsets = [0, 180], sizes = [4, 16], strides = [1, 1]} : vector<4x288xf32> to vector<4x16xf32>
    %19 = vector.extract_strided_slice %7 {offsets = [0, 198], sizes = [4, 16], strides = [1, 1]} : vector<4x288xf32> to vector<4x16xf32>
    %20 = vector.extract_strided_slice %7 {offsets = [0, 216], sizes = [4, 16], strides = [1, 1]} : vector<4x288xf32> to vector<4x16xf32>
    %21 = vector.extract_strided_slice %7 {offsets = [0, 234], sizes = [4, 16], strides = [1, 1]} : vector<4x288xf32> to vector<4x16xf32>
    %22 = vector.extract_strided_slice %7 {offsets = [0, 252], sizes = [4, 16], strides = [1, 1]} : vector<4x288xf32> to vector<4x16xf32>
    %23 = vector.extract_strided_slice %7 {offsets = [0, 270], sizes = [4, 16], strides = [1, 1]} : vector<4x288xf32> to vector<4x16xf32>
    %24 = tpu.concatenate %8, %9, %10, %11, %12, %13, %14, %15, %16, %17, %18, %19, %20, %21, %22, %23 in 1 : vector<4x16xf32>, vector<4x16xf32>, vector<4x16xf32>, vector<4x16xf32>, vector<4x16xf32>, vector<4x16xf32>, vector<4x16xf32>, vector<4x16xf32>, vector<4x16xf32>, vector<4x16xf32>, vector<4x16xf32>, vector<4x16xf32>, vector<4x16xf32>, vector<4x16xf32>, vector<4x16xf32>, vector<4x16xf32> -> vector<4x256xf32>
    %c0_6 = arith.constant 0 : index
    %c0_7 = arith.constant 0 : index
    %c0_8 = arith.constant 0 : index
    %25 = vector.load %arg4[%c0_6, %c0_7, %c0_8] : memref<1x4x256xf32, #tpu.memory_space<vmem>>, vector<1x4x256xf32>
    %26 = vector.shape_cast %25 : vector<1x4x256xf32> to vector<4x256xf32>
    %27 = vector.shape_cast %24 : vector<4x256xf32> to vector<1x4x256xf32>
    tpu.vector_store %arg4[%c0_6, %c0_7, %c0_8], %27 {strides = array<i32>} : memref<1x4x256xf32, #tpu.memory_space<vmem>>, vector<1x4x256xf32>,
    return
  }
  func.func @transform_0(%arg0: i32) -> (i32, i32, i32) {
    %c0_i32 = arith.constant 0 : i32
    %c0_i32_0 = arith.constant 0 : i32
    %c0_i32_1 = arith.constant 0 : i32
    return %arg0, %c0_i32, %c0_i32_0 : i32, i32, i32
  }
  func.func @transform_1(%arg0: i32) -> (i32, i32) {
    %c0_i32 = arith.constant 0 : i32
    %c0_i32_0 = arith.constant 0 : i32
    %c0_i32_1 = arith.constant 0 : i32
    return %c0_i32, %c0_i32_0 : i32, i32
  }
  func.func @transform_2(%arg0: i32) -> (i32, i32) {
    %c0_i32 = arith.constant 0 : i32
    %c0_i32_0 = arith.constant 0 : i32
    %c0_i32_1 = arith.constant 0 : i32
    return %c0_i32, %c0_i32_0 : i32, i32
  }
  func.func @transform_3(%arg0: i32) -> (i32, i32, i32) {
    %c0_i32 = arith.constant 0 : i32
    %c0_i32_0 = arith.constant 0 : i32
    %c0_i32_1 = arith.constant 0 : i32
    return %arg0, %c0_i32, %c0_i32_0 : i32, i32, i32
  }
}

</mosaic_0001>

<bundles_post_ra>
// kernel: unet_innermost_forward.3
= control target key start
LH: loop header
LB: loop body
LE: loop exit
PB: predicated region body
PF: predicated region fallthrough
CT: control target
= control target key end

     0   :  { %s423_s12 = smov 0   ;;  %s452_s0 = inlined_call_operand.vmem [shape: f32[2,4,288], index: 0, kind: input, shape index: {}]   ;;  %s453_s1 = inlined_call_operand.vmem [shape: f32[4,1], index: 1, kind: input, shape index: {}]   ;;  %s454_s2 = inlined_call_operand.vmem [shape: f32[4,1], index: 2, kind: input, shape index: {}]   ;;  %s455_s3 = inlined_call_operand.vmem [shape: f32[2,4,256], index: 3, kind: output, shape index: {}]  }
   0x1 LB: > { %s340_s13 = sadd.s32 4294967295, %s384_s12   ;;  %p344_p0 = scmp.ge.s32.totalorder %s384_s12, 1  ;;  %s384_s12 = sphi %s423_s12, %s13_s12  }
   0x2   : > { %p137_p1 = scmp.lt.s32.totalorder %s384_s12, 3 }
   0x4   : > { %p138_p2 = pnand %p344_p0, %p137_p1 }
   0x5   : > { %p161_p3 = scmp.lt.s32.totalorder (!%p138_p2), %s340_s13, 1  ;;  %s388_s22 = smov (!%p138_p2), 100  }
   0x6   : > { %141 = sbr.rel (%p138_p2) target bundleno = 297 (0x129), region = 32  ;;  %s389_s23 = smov (!%p138_p2), 126  }
   0x7   : > { %s390_s24 = smov (!%p138_p2), 114   ;;  %s391_s25 = smov (!%p138_p2), 124  }
   0x8   : > { %s392_s26 = smov (!%p138_p2), 122   ;;  %s393_s27 = smov (!%p138_p2), 110  }
   0x9   : > { %s394_s28 = smov (!%p138_p2), 120   ;;  %s395_s29 = smov (!%p138_p2), 108  }
   0xa   : > { %s396_s30 = smov (!%p138_p2), 118   ;;  %s397_s4 = smov (!%p138_p2), 106  }
   0xb   : > { %v173_v0 = vld [vmem:[%s453_s1] sm:$0xf]  ;;  %v386_v1 = vmov 0   ;;  %v387_v3 = vmov 839922192   ;;  %v181_v5 = vlaneseq  ;;  %s457_s13 = smov (!%p161_p3, %s340_s13), 1 }
   0xc   : > { %377 = vset.pattern.permute.xlu0 %v386_v1  ;;  %v188_v2 = vld [vmem:[%s454_s2] sm:$0xf]  ;;  %v179_v4 = vunpack.c.l.s4 %v387_v3  ;;  %s351_s18 = smul.u32 12, %s457_s13  ;;  %s398_s5 = smov 116   ;;  %vm259_vm0 = vcmask 130048   ;;  %vm261_vm1 = vcmask 261120  }
   0xd   : > { %176 = vperm.xlu0 %377, %v173_v0   ;;  %v182_v7 = vshrl.u32 %v181_v5, 7  ;;  %s399_s6 = smov 104   ;;  %s400_s7 = smov 102   ;;  %vm263_vm2 = vcmask 392192   ;;  %vm253_vm3 = vcmask 818176   ;;  %vm265_vm4 = vcmask 523264  }
   0xe   : > { %v180_v6 = vunpack.c.0.s8 %v179_v4  ;;  %s165_s21 = scalar_lea.vmem %s452_s0, %s351_s18  ;;  %s401_s8 = smov 112   ;;  %vm267_vm5 = vcmask 654336   ;;  %vm269_vm6 = vcmask 785408   ;;  %vm227_vm7 = vcmask 932864  }
   0xf   : > { %v171_v11 = vld [vmem:[%s165_s21] sm:$0xff]  ;;  %v172_v12 = vld [vmem:[%s165_s21 + $0x8] sm:$0xf]  ;;  %s402_s9 = smov 98   ;;  %s350_s10 = sshll.u32 %s457_s13, 3  ;;  %vm271_vm8 = vcmask 916480  }
  0x10   : > { %v183_v8 = vsub.s32 %v180_v6, %v182_v7  ;;  %s170_s15 = scalar_lea.vmem %s455_s3, %s350_s10 }
  0x11   : > { %191 = vperm.xlu0 %377, %v188_v2  }
  0x88   : > { %v177_v9 = vpop.permute.xlu0 %176 }
  0x89   : > { %v184_v10 = vrot.slane %v177_v9, %v183_v8 }
  0x8b   : > { %v186_v14 = vmul.f32 %v184_v10, %v171_v11  ;;  %v187_v15 = vmul.f32 %v184_v10, %v172_v12 }
  0x8c   : > { %v192_v13 = vpop.permute.xlu0 %191 }
  0x8d   : > { %v199_v16 = vrot.slane %v192_v13, %v183_v8 }
  0x8f   : > { %v201_v17 = vadd.f32 %v199_v16, %v186_v14  ;;  %v202_v18 = vadd.f32 %v199_v16, %v187_v15 }
  0x91   : > { %251 = vrot.lane.b32.xlu0 %v202_v18, %s388_s22  ;;  %204 = vrot.lane.b32.xlu1 %v201_v17, %s389_s23  ;;  %v222_v19 = vcombine.high %v201_v17, %v201_v17 }
  0x95   : > { %223 = vrot.lane.b32.xlu0 %v201_v17, %s390_s24  ;;  %207 = vrot.lane.b32.xlu1 %v201_v17, %s391_s25 }
  0x99   : > { %210 = vrot.lane.b32.xlu1 %v201_v17, %s392_s26  ;;  %233 = vrot.lane.b32.xlu0 %v222_v19, %s393_s27 }
  0x9d   : > { %213 = vrot.lane.b32.xlu1 %v201_v17, %s394_s28  ;;  %236 = vrot.lane.b32.xlu0 %v222_v19, %s395_s29 }
  0xa1   : > { %216 = vrot.lane.b32.xlu1 %v201_v17, %s396_s30  ;;  %239 = vrot.lane.b32.xlu0 %v222_v19, %s397_s4 }
  0xa5   : > { %219 = vrot.lane.b32.xlu1 %v201_v17, %s398_s5  ;;  %242 = vrot.lane.b32.xlu0 %v222_v19, %s399_s6 }
  0xa9   : > { %245 = vrot.lane.b32.xlu0 %v222_v19, %s400_s7  ;;  %230 = vrot.lane.b32.xlu1 %v222_v19, %s401_s8 }
  0xad   : > { %256 = vrot.lane.b32.xlu0 %v202_v18, %s402_s9  ;;  %249 = vrot.lane.b32.xlu1 %v222_v19, %s388_s22 }
  0xb1   : > { %225 = vrot.lane.b32.xlu1 %v222_v19, %s390_s24 }
 0x103   : > { %v252_v20 = vpop.permute.xlu0 %251  ;;  %v205_v21 = vpop.permute.xlu1 %204 }
 0x104   : > { %v260_v37 = vsel %vm259_vm0, %v201_v17, %v205_v21 }
 0x107   : > { %v224_v22 = vpop.permute.xlu0 %223  ;;  %v208_v23 = vpop.permute.xlu1 %207 }
 0x108   : > { %v262_v40 = vsel %vm261_vm1, %v260_v37, %v208_v23 }
 0x10b   : > { %v211_v24 = vpop.permute.xlu1 %210  ;;  %v234_v25 = vpop.permute.xlu0 %233 }
 0x10c   : > { %v264_v43 = vsel %vm263_vm2, %v262_v40, %v211_v24 }
 0x10f   : > { %v214_v26 = vpop.permute.xlu1 %213  ;;  %v237_v27 = vpop.permute.xlu0 %236 }
 0x110   : > { %v266_v44 = vsel %vm265_vm4, %v264_v43, %v214_v26 }
 0x113   : > { %v217_v28 = vpop.permute.xlu1 %216  ;;  %v240_v29 = vpop.permute.xlu0 %239 }
 0x114   : > { %v268_v46 = vsel %vm267_vm5, %v266_v44, %v217_v28 }
 0x117   : > { %v220_v30 = vpop.permute.xlu1 %219  ;;  %v243_v31 = vpop.permute.xlu0 %242 }
 0x118   : > { %v270_v48 = vsel %vm269_vm6, %v268_v46, %v220_v30 }
 0x11b   : > { %v231_v32 = vpop.permute.xlu1 %230  ;;  %v246_v35 = vpop.permute.xlu0 %245 }
 0x11c   : > { %v273_v33 = vsel %vm259_vm0, %v231_v32, %v234_v25 }
 0x11d   : > { %v274_v34 = vsel %vm261_vm1, %v273_v33, %v237_v27 }
 0x11e   : > { %v275_v36 = vsel %vm263_vm2, %v274_v34, %v240_v29 }
 0x11f   : > { %v276_v38 = vsel %vm265_vm4, %v275_v36, %v243_v31  ;;  %v250_v39 = vpop.permute.xlu1 %249  ;;  %v257_v49 = vpop.permute.xlu0 %256 }
 0x120   : > { %v277_v41 = vsel %vm267_vm5, %v276_v38, %v246_v35  ;;  %v254_v42 = vsel %vm253_vm3, %v250_v39, %v252_v20 }
 0x121   : > { %v278_v45 = vsel %vm269_vm6, %v277_v41, %v254_v42 }
 0x122   : > { %v279_v51 = vsel %vm271_vm8, %v278_v45, %v257_v49 }
 0x123   : > { %v226_v47 = vpop.permute.xlu1 %225 }
 0x124   : > { %v228_v50 = vsel %vm227_vm7, %v224_v22, %v226_v47 }
 0x125   : > { %v272_v52 = vsel %vm271_vm8, %v270_v48, %v228_v50 }
 0x126   : > { %v282_v53 = vcombine.low %v272_v52, %v279_v51 }
 0x128   : > { %284 = vst [vmem:[%s170_s15] sm:$0xff] %v282_v53 }
 0x129 PF: > { %s13_s12 = sadd.s32 1, %s384_s12  }
 0x12a   : > { %p10_p4 = scmp.ge.s32.totalorder %s13_s12, 4  }
 0x12c   :  { %12 = sbr.rel (!%p10_p4) target bundleno = 1 (0x1), region = 62 }

// kernel: unet_innermost_forward.2
= control target key start
LH: loop header
LB: loop body
LE: loop exit
PB: predicated region body
PF: predicated region fallthrough
CT: control target
= control target key end

     0   :  { %s1784_s27 = smov 0   ;;  %s2088_s0 = inlined_call_operand.vmem [shape: bf16[2,64,64], index: 0, kind: input, shape index: {}]   ;;  %s2089_s1 = inlined_call_operand.vmem [shape: bf16[8,64], index: 1, kind: input, shape index: {}]   ;;  %s2090_s2 = inlined_call_operand.vmem [shape: f32[144,64], index: 2, kind: input, shape index: {}]   ;;  %s2091_s3 = inlined_call_operand.vmem [shape: f32[8,18], index: 3, kind: input, shape index: {}]   ;;  %s2092_s4 = inlined_call_operand.vmem [shape: bf16[4,72], index: 4, kind: input, shape index: {}]   ;;  %s2093_s5 = inlined_call_operand.vmem [shape: f32[2,8,64], index: 5, kind: output, shape index: {0}]   ;;  %s2094_s6 = inlined_call_operand.vmem [shape: f32[2,4,288], index: 6, kind: output, shape index: {1}]   ;;  %s2095_s7 = inlined_call_operand.vmem [shape: f32[2,4,1], index: 7, kind: output, shape index: {2}]   ;;  %s2096_s8 = inlined_call_operand.vmem [shape: f32[2,4,1], index: 8, kind: output, shape index: {3}]  }
   0x1 LB: > { %s1447_s28 = sadd.s32 4294967295, %s1708_s27   ;;  %p1451_p0 = scmp.ge.s32.totalorder %s1708_s27, 1  ;;  %s1708_s27 = sphi %s1784_s27, %s19_s27  }
   0x2   : > { %p269_p1 = scmp.lt.s32.totalorder %s1708_s27, 3 }
   0x4   : > { %p270_p2 = pnand %p1451_p0, %p269_p1 }
   0x5   : > { %p315_p3 = scmp.lt.s32.totalorder (!%p270_p2), %s1447_s28, 1  ;;  %s1712_s17 = smov (!%p270_p2), 88  }
   0x6   : > { %273 = sbr.rel (%p270_p2) target bundleno = 1506 (0x5e2), region = 40  ;;  %s1713_s18 = smov (!%p270_p2), 72  }
   0x7   : > { %s1714_s21 = smov (!%p270_p2), 96   ;;  %s1715_s22 = smov (!%p270_p2), 80  }
   0x8   : > { %s1716_s23 = smov (!%p270_p2), 112   ;;  %s1717_s24 = smov (!%p270_p2), 104  }
   0x9   : > { %s1718_s25 = smov (!%p270_p2), 120   ;;  %s1719_s26 = smov (!%p270_p2), 18  }
   0xa   : > { %s1721_s30 = smov (!%p270_p2), 34   ;;  %s1722_s9 = smov (!%p270_p2), 52  }
   0xb   : > { %v1710_v0 = vmov 0.0   ;;  %vm1711_vm0 = vmmov 0   ;;  %s2106_s28 = smov (!%p315_p3, %s1447_s28), 1  ;;  %v338_v5 = vld [vmem:[%s2089_s1] sm:$0xf]  ;;  %vm371_vm1 = vcmask 523264  }
   0xc   : > { %1562 = vmatprep.subr.bf16.mxu0 %v1710_v0  ;;  %1570 = vmatprep.mubr.msk.bf16.mxu0 %vm1711_vm0, %v1710_v0  ;;  %s1505_s29 = sshll.u32 %s2106_s28, 5  ;;  %s1454_s13 = sshll.u32 %s2106_s28, 3  ;;  %v439_v11 = vld [vmem:[%s2090_s2] sm:$0xff]  ;;  %v440_v19 = vld [vmem:[%s2090_s2 + $0x8] sm:$0xff]  ;;  %v441_v20 = vld [vmem:[%s2090_s2 + $0x10] sm:$0xff]  ;;  %vm667_vm2 = vcmask 64512  }
   0xd   : > { %s319_s10 = scalar_lea.vmem %s2088_s0, %s1505_s29  ;;  %s323_s16 = scalar_lea.vmem %s2093_s5, %s1454_s13  ;;  %1590 = vmatprep.mubr.msk.f32.mxu1 %vm371_vm1, %v439_v11  ;;  %v442_v21 = vld [vmem:[%s2090_s2 + $0x18] sm:$0xff]  ;;  %v443_v22 = vld [vmem:[%s2090_s2 + $0x20] sm:$0xff]  ;;  %v444_v23 = vld [vmem:[%s2090_s2 + $0x28] sm:$0xff]  ;;  %vm939_vm3 = vcmask 293888   ;;  %vm937_vm4 = vcmask 146432   ;;  %vm951_vm5 = vcmask 130048  }
   0xe   : > { %v1698_v1 = vld [vmem:[%s319_s10 + $0x18] sm:$0xff]   ;;  %v1699_v2 = vld [vmem:[%s319_s10 + $0x10] sm:$0xff]   ;;  %v1700_v3 = vld [vmem:[%s319_s10 + $0x8] sm:$0xff]   ;;  %s1720_s29 = smov 16   ;;  %s1724_s11 = smov 126   ;;  %vm953_vm6 = vcmask 277504  }
   0xf   : > { %1563 = vmatpush3.bf16.msra.mxu0 %v1698_v1  ;;  %v1701_v4 = vld [vmem:[%s319_s10] sm:$0xff]   ;;  %v445_v24 = vld [vmem:[%s2090_s2 + $0x30] sm:$0xff]  ;;  %v446_v25 = vld [vmem:[%s2090_s2 + $0x38] sm:$0xff]  ;;  %s1723_s10 = smov 70   ;;  %s1725_s12 = smov 106   ;;  %vm955_vm7 = vcmask 424960  }
  0x10   : > { %1564 = vmatprep.subr.bf16.mxu0 %v1710_v0  ;;  %v447_v26 = vld [vmem:[%s2090_s2 + $0x40] sm:$0xff]  ;;  %v448_v27 = vld [vmem:[%s2090_s2 + $0x48] sm:$0xff]  ;;  %v449_v28 = vld [vmem:[%s2090_s2 + $0x50] sm:$0xff]  ;;  %s1726_s13 = smov 36   ;;  %s1727_s14 = smov 14   ;;  %vm957_vm8 = vcmask 572416  }
  0x11   : > { %v450_v29 = vld [vmem:[%s2090_s2 + $0x58] sm:$0xff]  ;;  %v451_v30 = vld [vmem:[%s2090_s2 + $0x60] sm:$0xff]  ;;  %v452_v31 = vld [vmem:[%s2090_s2 + $0x68] sm:$0xff]  ;;  %s1728_s15 = smov 54   ;;  %s1730_s19 = smov 108   ;;  %vm941_vm9 = vcmask 441344  }
  0x12   : > { %v453_v32 = vld [vmem:[%s2090_s2 + $0x70] sm:$0xff]  ;;  %v454_v33 = vld [vmem:[%s2090_s2 + $0x78] sm:$0xff]  ;;  %v455_v34 = vld [vmem:[%s2090_s2 + $0x80] sm:$0xff]  ;;  %s1731_s20 = smov 124   ;;  %vm943_vm10 = vcmask 588800   ;;  %vm945_vm11 = vcmask 736256  }
  0x13   : > { %1565 = vmatpush3.bf16.msra.mxu0 %v1699_v2  ;;  %v456_v35 = vld [vmem:[%s2090_s2 + $0x88] sm:$0xff]  ;;  %v666_v36 = vld [vmem:[%s2091_s3] sm:$0xff]  ;;  %vm2100_vm12 = vcmask 719872   ;;  %vm947_vm13 = vcmask 883712   ;;  %vm949_vm14 = vcmask 1031168   ;;  %vm2098_vm15 = vcmask 867328  }
  0x14   : > { %1566 = vmatprep.subr.bf16.mxu0 %v1710_v0 }
  0x17   : > { %1567 = vmatpush3.bf16.msra.mxu0 %v1700_v3 }
  0x18   : > { %1568 = vmatprep.subr.bf16.mxu0 %v1710_v0 }
  0x1b   : > { %1569 = vmatpush3.bf16.msra.mxu0 %v1701_v4 }
  0x1c   : > { %1617 = vmatprep.subr.mxu0 %v666_v36 }
  0x1e   : > { %1571 = vmatmul.mubr.msk.bf16.vlgmr.msra.gmra.mxu0 %vm371_vm1, %v338_v5 }
  0x1f   : > { %1618 = vmatpush3.msra.mxu0 %v666_v36 }
  0x20   : > { %1646 = vmatprep.subr.bf16.mxu0 %v1710_v0 }
  0xde   : > { %v409_v6 = vpop.f32.mrf.mxu0 }
  0xdf   : > { %415 = vst.msk [vmem:[%s323_s16] sm:$0xff] %vm371_vm1, %v409_v6  ;;  %v416_v7 = vmax.f32 %v409_v6, 0.0  ;;  %s1729_s16 = smov 90  }
  0xe0   : > { %v1572_v8 = vpop.f32.mrf.mxu0 }
  0xe1   : > { %430 = vrot.lane.b32.xlu1 %v416_v7, %s1712_s17  ;;  %436 = vrot.lane.b32.xlu0 %v416_v7, %s1713_s18 }
  0xe2   : > { %v412_v9 = vpop.f32.mrf.mxu0 }
  0xe4   : > { %v1573_v10 = vpop.f32.mrf.mxu0 }
  0xe5   : > { %427 = vrot.lane.b32.xlu1 %v416_v7, %s1714_s21  ;;  %433 = vrot.lane.b32.xlu0 %v416_v7, %s1715_s22  ;;  %s1732_s21 = smov 32   ;;  %s1733_s22 = smov 91  }
  0xe9   : > { %421 = vrot.lane.b32.xlu1 %v416_v7, %s1716_s23  ;;  %424 = vrot.lane.b32.xlu0 %v416_v7, %s1717_s24  ;;  %s1734_s23 = smov 92   ;;  %s1735_s24 = smov 110  }
  0xed   : > { %418 = vrot.lane.b32.xlu0 %v416_v7, %s1718_s25  ;;  %s1736_s25 = smov 109  }
 0x153   : > { %v431_v12 = vpop.permute.xlu1 %430  ;;  %v437_v13 = vpop.permute.xlu0 %436 }
 0x154   : > { %1574 = vmatprep.subr.mxu1 %v437_v13 }
 0x155   : > { %1575 = vmatpush3.msra.mxu1 %v437_v13 }
 0x157   : > { %v434_v14 = vpop.permute.xlu0 %433  ;;  %v428_v15 = vpop.permute.xlu1 %427 }
 0x158   : > { %1576 = vmatprep.subr.mxu1 %v434_v14 }
 0x159   : > { %1577 = vmatpush3.msra.mxu1 %v434_v14 }
 0x15a   : > { %1578 = vmatprep.subr.mxu1 %v431_v12 }
 0x15b   : > { %1579 = vmatpush3.msra.mxu1 %v431_v12  ;;  %v425_v16 = vpop.permute.xlu0 %424  ;;  %v422_v17 = vpop.permute.xlu1 %421 }
 0x15c   : > { %1580 = vmatprep.subr.mxu1 %v428_v15 }
 0x15d   : > { %1581 = vmatpush3.msra.mxu1 %v428_v15 }
 0x15e   : > { %1582 = vmatprep.subr.mxu1 %v425_v16 }
 0x15f   : > { %1583 = vmatpush3.msra.mxu1 %v425_v16  ;;  %v419_v18 = vpop.permute.xlu0 %418 }
 0x160   : > { %1584 = vmatprep.subr.mxu1 %v422_v17 }
 0x161   : > { %1585 = vmatpush3.msra.mxu1 %v422_v17 }
 0x162   : > { %1586 = vmatprep.subr.mxu1 %v419_v18 }
 0x163   : > { %1587 = vmatpush3.msra.mxu1 %v419_v18 }
 0x164   : > { %1588 = vmatprep.subr.mxu1 %v416_v7 }
 0x165   : > { %1589 = vmatpush3.msra.mxu1 %v416_v7 }
 0x166   : > { %1591 = vmatmul.mubr.msk.f32.vlgmr.msra.gmra.mxu1 %vm371_vm1, %v440_v19 }
 0x167   : > { %1593 = vmatprep.mubr.msk.f32.mxu1 %vm371_vm1, %v441_v20 }
 0x16a   : > { %1594 = vmatmul.mubr.msk.f32.gmra.mxu1 %vm371_vm1, %v442_v21 }
 0x16b   : > { %1596 = vmatprep.mubr.msk.f32.mxu1 %vm371_vm1, %v443_v22 }
 0x16e   : > { %1597 = vmatmul.mubr.msk.f32.gmra.mxu1 %vm371_vm1, %v444_v23 }
 0x16f   : > { %1599 = vmatprep.mubr.msk.f32.mxu1 %vm371_vm1, %v445_v24 }
 0x172   : > { %1600 = vmatmul.mubr.msk.f32.gmra.mxu1 %vm371_vm1, %v446_v25 }
 0x173   : > { %1602 = vmatprep.mubr.msk.f32.mxu1 %vm371_vm1, %v447_v26 }
 0x176   : > { %1603 = vmatmul.mubr.msk.f32.gmra.mxu1 %vm371_vm1, %v448_v27 }
 0x177   : > { %1605 = vmatprep.mubr.msk.f32.mxu1 %vm371_vm1, %v449_v28 }
 0x17a   : > { %1606 = vmatmul.mubr.msk.f32.gmra.mxu1 %vm371_vm1, %v450_v29 }
 0x17b   : > { %1608 = vmatprep.mubr.msk.f32.mxu1 %vm371_vm1, %v451_v30 }
 0x17e   : > { %1609 = vmatmul.mubr.msk.f32.gmra.mxu1 %vm371_vm1, %v452_v31 }
 0x17f   : > { %1611 = vmatprep.mubr.msk.f32.mxu1 %vm371_vm1, %v453_v32 }
 0x182   : > { %1612 = vmatmul.mubr.msk.f32.gmra.mxu1 %vm371_vm1, %v454_v33 }
 0x183   : > { %1614 = vmatprep.mubr.msk.f32.mxu1 %vm371_vm1, %v455_v34 }
 0x186   : > { %1615 = vmatmul.mubr.msk.f32.gmra.mxu1 %vm371_vm1, %v456_v35  ;;  %vm2099_vm1 = vcmask 113664  }
 0x226   : > { %v1592_v37 = vpop.f32.mrf.mxu1 }
 0x228   : > { %v577_v38 = vpop.f32.mrf.mxu1 }
 0x229   : > { %1619 = vmatprep.mubr.msk.f32.mxu0 %vm667_vm2, %v577_v38 }
 0x22a   : > { %v1595_v39 = vpop.f32.mrf.mxu1  ;;  %1620 = vmatmul.mubr.msk.f32.vlgmr.msra.gmra.mxu0 %vm667_vm2, %v1592_v37 }
 0x22c   : > { %v587_v40 = vpop.f32.mrf.mxu1 }
 0x22d   : > { %1622 = vmatprep.mubr.msk.f32.mxu0 %vm667_vm2, %v587_v40 }
 0x22e   : > { %v1598_v41 = vpop.f32.mrf.mxu1  ;;  %1623 = vmatmul.mubr.msk.f32.gmra.mxu0 %vm667_vm2, %v1595_v39 }
 0x230   : > { %v597_v42 = vpop.f32.mrf.mxu1 }
 0x231   : > { %1625 = vmatprep.mubr.msk.f32.mxu0 %vm667_vm2, %v597_v42 }
 0x232   : > { %v1601_v43 = vpop.f32.mrf.mxu1  ;;  %1626 = vmatmul.mubr.msk.f32.gmra.mxu0 %vm667_vm2, %v1598_v41 }
 0x234   : > { %v607_v44 = vpop.f32.mrf.mxu1 }
 0x235   : > { %1628 = vmatprep.mubr.msk.f32.mxu0 %vm667_vm2, %v607_v44 }
 0x236   : > { %v1604_v45 = vpop.f32.mrf.mxu1  ;;  %1629 = vmatmul.mubr.msk.f32.gmra.mxu0 %vm667_vm2, %v1601_v43 }
 0x238   : > { %v617_v46 = vpop.f32.mrf.mxu1 }
 0x239   : > { %1631 = vmatprep.mubr.msk.f32.mxu0 %vm667_vm2, %v617_v46 }
 0x23a   : > { %v1607_v47 = vpop.f32.mrf.mxu1  ;;  %1632 = vmatmul.mubr.msk.f32.gmra.mxu0 %vm667_vm2, %v1604_v45 }
 0x23c   : > { %v627_v48 = vpop.f32.mrf.mxu1 }
 0x23d   : > { %1634 = vmatprep.mubr.msk.f32.mxu0 %vm667_vm2, %v627_v48 }
 0x23e   : > { %v1610_v49 = vpop.f32.mrf.mxu1  ;;  %1635 = vmatmul.mubr.msk.f32.gmra.mxu0 %vm667_vm2, %v1607_v47 }
 0x240   : > { %v637_v50 = vpop.f32.mrf.mxu1 }
 0x241   : > { %1637 = vmatprep.mubr.msk.f32.mxu0 %vm667_vm2, %v637_v50 }
 0x242   : > { %v1613_v51 = vpop.f32.mrf.mxu1  ;;  %1638 = vmatmul.mubr.msk.f32.gmra.mxu0 %vm667_vm2, %v1610_v49 }
 0x244   : > { %v647_v52 = vpop.f32.mrf.mxu1 }
 0x245   : > { %1640 = vmatprep.mubr.msk.f32.mxu0 %vm667_vm2, %v647_v52  ;;  %v1210_v52 = vlaneseq }
 0x246   : > { %v1616_v53 = vpop.f32.mrf.mxu1  ;;  %1641 = vmatmul.mubr.msk.f32.gmra.mxu0 %vm667_vm2, %v1613_v51  ;;  %v1738_v51 = vmov 0  }
 0x247   : > { %1154 = vmatprep.mubr.bf16.mxu1 %v1738_v51 }
 0x248   : > { %v657_v54 = vpop.f32.mrf.mxu1 }
 0x249   : > { %1643 = vmatprep.mubr.msk.f32.mxu0 %vm667_vm2, %v657_v54 }
 0x24a   : > { %1644 = vmatmul.mubr.msk.f32.gmra.mxu0 %vm667_vm2, %v1616_v53  ;;  %vm977_vm2 = vcmask 261120   ;;  %v1211_v53 = vand.u32 127, %v1210_v52 }
 0x24b   : > { %1656 = vmatprep.mubr.msk.bf16.mxu0 %vm1711_vm0, %v1710_v0  ;;  %vm2097_vm0 = vcmask 1014784  }
 0x2ea   : > { %v1621_v55 = vpop.f32.mrf.mxu0 }
 0x2eb   : > { %878 = vrot.lane.b32.xlu0 %v1621_v55, %s1719_s26 }
 0x2ec   : > { %v1912_v56 = vpop.f32.mrf.mxu0 }
 0x2ee   : > { %v1624_v57 = vpop.f32.mrf.mxu0 }
 0x2f0   : > { %v798_v58 = vpop.f32.mrf.mxu0 }
 0x2f2   : > { %v1627_v59 = vpop.f32.mrf.mxu0 }
 0x2f4   : > { %v808_v60 = vpop.f32.mrf.mxu0 }
 0x2f6   : > { %v1630_v61 = vpop.f32.mrf.mxu0 }
 0x2f8   : > { %v818_v62 = vpop.f32.mrf.mxu0 }
 0x2fa   : > { %v1633_v63 = vpop.f32.mrf.mxu0 }
 0x2fc   : > { %v828_v1 = vpop.f32.mrf.mxu0 }
 0x2fd   : > { %906 = vrot.lane.b32.xlu0 %v828_v1, %s1720_s29 }
 0x2fe   : > { %v1636_v2 = vpop.f32.mrf.mxu0 }
 0x300   : > { %v838_v3 = vpop.f32.mrf.mxu0 }
 0x301   : > { %910 = vrot.lane.b32.xlu0 %v1633_v63, %s1721_s30 }
 0x302   : > { %v1639_v4 = vpop.f32.mrf.mxu0 }
 0x304   : > { %v848_v5 = vpop.f32.mrf.mxu0 }
 0x305   : > { %914 = vrot.lane.b32.xlu0 %v838_v3, %s1722_s9 }
 0x306   : > { %v1642_v6 = vpop.f32.mrf.mxu0 }
 0x308   : > { %v858_v7 = vpop.f32.mrf.mxu0 }
 0x309   : > { %918 = vrot.lane.b32.xlu0 %v1636_v2, %s1723_s10 }
 0x30a   : > { %v1645_v8 = vpop.f32.mrf.mxu0 }
 0x30b   : > { %968 = vrot.lane.b32.xlu1 %v1645_v8, %s1719_s26 }
 0x30c   : > { %v868_v11 = vpop.f32.mrf.mxu0 }
 0x30d   : > { %922 = vrot.lane.b32.xlu0 %v848_v5, %s1712_s17 }
 0x30f   : > { %902 = vrot.lane.b32.xlu1 %v1630_v61, %s1724_s11 }
 0x311   : > { %926 = vrot.lane.b32.xlu0 %v1639_v4, %s1725_s12 }
 0x313   : > { %882 = vrot.lane.b32.xlu1 %v798_v58, %s1726_s13 }
 0x315   : > { %934 = vrot.lane.b32.xlu0 %v1642_v6, %s1727_s14 }
 0x317   : > { %886 = vrot.lane.b32.xlu1 %v1624_v57, %s1728_s15 }
 0x31b   : > { %890 = vrot.lane.b32.xlu1 %v808_v60, %s1713_s18 }
 0x31f   : > { %894 = vrot.lane.b32.xlu1 %v1627_v59, %s1729_s16 }
 0x323   : > { %898 = vrot.lane.b32.xlu1 %v818_v62, %s1730_s19 }
 0x327   : > { %930 = vrot.lane.b32.xlu1 %v858_v7, %s1731_s20 }
 0x35d   : > { %v879_v9 = vpop.permute.xlu0 %878 }
 0x35e   : > { %v938_v25 = vsel %vm937_vm4, %v1912_v56, %v879_v9 }
 0x36f   : > { %v907_v10 = vpop.permute.xlu0 %906 }
 0x373   : > { %v911_v15 = vpop.permute.xlu0 %910 }
 0x377   : > { %v915_v18 = vpop.permute.xlu0 %914 }
 0x37b   : > { %v919_v21 = vpop.permute.xlu0 %918 }
 0x37d   : > { %v969_v12 = vpop.permute.xlu1 %968 }
 0x37e   : > { %v971_v13 = vsel %vm937_vm4, %v868_v11, %v969_v12 }
 0x37f   : > { %v972_v14 = vsel %vm939_vm3, %v971_v13, 0.0  ;;  %v923_v27 = vpop.permute.xlu0 %922 }
 0x380   : > { %974 = vrot.lane.b32.xlu1 %v972_v14, %s1732_s21  ;;  %s1737_s21 = smov 127  }
 0x381   : > { %v903_v16 = vpop.permute.xlu1 %902 }
 0x382   : > { %v952_v20 = vsel %vm951_vm5, %v903_v16, %v907_v10 }
 0x383   : > { %v954_v22 = vsel %vm953_vm6, %v952_v20, %v911_v15  ;;  %v927_v37 = vpop.permute.xlu0 %926 }
 0x384   : > { %v956_v24 = vsel %vm955_vm7, %v954_v22, %v915_v18 }
 0x385   : > { %v883_v17 = vpop.permute.xlu1 %882  ;;  %v958_v29 = vsel %vm957_vm8, %v956_v24, %v919_v21 }
 0x386   : > { %v940_v28 = vsel %vm939_vm3, %v938_v25, %v883_v17  ;;  %v960_v34 = vsel %vm2100_vm12, %v958_v29, %v923_v27  ;;  %vm1012_vm12 = vcmask 900096  }
 0x387   : > { %v962_v39 = vsel %vm2098_vm15, %v960_v34, %v927_v37  ;;  %v935_v45 = vpop.permute.xlu0 %934  ;;  %vm1039_vm15 = vcmask 752640  }
 0x389   : > { %v887_v19 = vpop.permute.xlu1 %886 }
 0x38a   : > { %v942_v30 = vsel %vm941_vm9, %v940_v28, %v887_v19 }
 0x38d   : > { %v891_v23 = vpop.permute.xlu1 %890 }
 0x38e   : > { %v944_v31 = vsel %vm943_vm10, %v942_v30, %v891_v23 }
 0x391   : > { %v895_v26 = vpop.permute.xlu1 %894 }
 0x392   : > { %v946_v32 = vsel %vm945_vm11, %v944_v31, %v895_v26 }
 0x395   : > { %v899_v33 = vpop.permute.xlu1 %898 }
 0x396   : > { %v948_v35 = vsel %vm947_vm13, %v946_v32, %v899_v33 }
 0x397   : > { %v950_v36 = vsel %vm949_vm14, %v948_v35, %v903_v16 }
 0x398   : > { %v1944_v38 = vpack.c.bf16 %v950_v36, %v950_v36 }
 0x399   : > { %v931_v40 = vpop.permute.xlu1 %930 }
 0x39a   : > { %v964_v41 = vsel %vm2097_vm0, %v962_v39, %v931_v40  ;;  %1051 = vrot.lane.b32.xlu0 %v1944_v38, %s1729_s16  ;;  %v985_v43 = vrot.slane %v1944_v38, 4  ;;  %v966_v46 = vsel %vm2099_vm1, %v931_v40, %v935_v45  ;;  %vm1048_vm0 = vcmask 744448  }
 0x39b   : > { %v1950_v42 = vpack.c.bf16 %v964_v41, %v964_v41  ;;  %vm1021_vm1 = vcmask 891904  }
 0x39d   : > { %1053 = vrot.lane.b32.xlu1 %v1950_v42, %s1729_s16  ;;  %v986_v44 = vrot.slane %v1950_v42, 4 }
 0x39e   : > { %1042 = vrot.lane.b32.xlu0 %v985_v43, %s1733_s22 }
 0x3a1   : > { %1035 = vrot.lane.b32.xlu1 %v1950_v42, %s1734_s23 }
 0x3a2   : > { %1024 = vrot.lane.b32.xlu0 %v985_v43, %s1730_s19 }
 0x3a5   : > { %1033 = vrot.lane.b32.xlu1 %v1944_v38, %s1734_s23 }
 0x3a6   : > { %1006 = vrot.lane.b32.xlu0 %v985_v43, %s1735_s24 }
 0x3a9   : > { %1017 = vrot.lane.b32.xlu1 %v1950_v42, %s1736_s25 }
 0x3ad   : > { %1015 = vrot.lane.b32.xlu1 %v1944_v38, %s1736_s25 }
 0x3b1   : > { %999 = vrot.lane.b32.xlu1 %v1950_v42, %s1724_s11 }
 0x3b5   : > { %997 = vrot.lane.b32.xlu1 %v1944_v38, %s1724_s11 }
 0x3b9   : > { %1044 = vrot.lane.b32.xlu1 %v986_v44, %s1733_s22 }
 0x3bd   : > { %1026 = vrot.lane.b32.xlu1 %v986_v44, %s1730_s19 }
 0x3c1   : > { %1008 = vrot.lane.b32.xlu1 %v986_v44, %s1735_s24 }
 0x3c5   : > { %990 = vrot.lane.b32.xlu1 %v986_v44, %s1737_s21 }
 0x3c9   : > { %988 = vrot.lane.b32.xlu1 %v985_v43, %s1737_s21 }
 0x3f2   : > { %v975_v47 = vpop.permute.xlu1 %974 }
 0x3f3   : > { %v978_v48 = vsel %vm977_vm2, %v966_v46, %v975_v47  ;;  %vm1212_vm2 = vcmp.lt.s32.totalorder %v1211_v53, 16  ;;  %v1109_v47 = vld [vmem:[%s2092_s4] sm:$0x3] }
 0x3f4   : > { %v1971_v49 = vpack.c.bf16 %v978_v48, %v978_v48  ;;  %v1984_v54 = vsel %vm1212_vm2, 1.0, %v1710_v0  ;;  %vm1060_vm2 = vcmask 1043456  }
 0x3f5   : > { %1234 = vrot.lane.b32.xlu1 %v1984_v54, %s1724_s11 }
 0x3f6   : > { %1055 = vrot.lane.b32.xlu0 %v1971_v49, %s1729_s16  ;;  %v987_v50 = vrot.slane %v1971_v49, 4 }
 0x3f9   : > { %1219 = vrot.lane.b32.xlu1 %v1984_v54, %s1726_s13 }
 0x3fa   : > { %1037 = vrot.lane.b32.xlu0 %v1971_v49, %s1734_s23 }
 0x3fd   : > { %1222 = vrot.lane.b32.xlu1 %v1984_v54, %s1728_s15 }
 0x3fe   : > { %1019 = vrot.lane.b32.xlu0 %v1971_v49, %s1736_s25 }
 0x401   : > { %1225 = vrot.lane.b32.xlu1 %v1984_v54, %s1713_s18 }
 0x402   : > { %1001 = vrot.lane.b32.xlu0 %v1971_v49, %s1724_s11 }
 0x405   : > { %1228 = vrot.lane.b32.xlu1 %v1984_v54, %s1729_s16 }
 0x406   : > { %1046 = vrot.lane.b32.xlu0 %v987_v50, %s1733_s22 }
 0x409   : > { %1231 = vrot.lane.b32.xlu1 %v1984_v54, %s1730_s19 }
 0x40a   : > { %1028 = vrot.lane.b32.xlu0 %v987_v50, %s1730_s19 }
 0x40c   : > { %v1052_v59 = vpop.permute.xlu0 %1051 }
 0x40d   : > { %1255 = vrot.lane.b32.xlu1 %v1984_v54, %s1731_s20 }
 0x40e   : > { %1010 = vrot.lane.b32.xlu0 %v987_v50, %s1735_s24 }
 0x40f   : > { %v1054_v55 = vpop.permute.xlu1 %1053 }
 0x410   : > { %v1043_v61 = vpop.permute.xlu0 %1042  ;;  %v1058_v3 = vsel %vm945_vm11, %v1052_v59, %v1054_v55 }
 0x411   : > { %v1114_v8 = vsel %vm1060_vm2, %v1058_v3, 0 }
 0x412   : > { %992 = vrot.lane.b32.xlu0 %v987_v50, %s1737_s21 }
 0x413   : > { %v1036_v56 = vpop.permute.xlu1 %1035 }
 0x414   : > { %v1025_v63 = vpop.permute.xlu0 %1024 }
 0x416   : > { %1216 = vrot.lane.b32.xlu0 %v1984_v54, %s1719_s26  ;;  %s1660_s26 = smul.u32 12, %s2106_s28 }
 0x417   : > { %v1034_v57 = vpop.permute.xlu1 %1033 }
 0x418   : > { %v1007_v2 = vpop.permute.xlu0 %1006  ;;  %v1040_v19 = vsel %vm1039_vm15, %v1034_v57, %v1036_v56 }
 0x41a   : > { %1237 = vrot.lane.b32.xlu0 %v1984_v54, %s1720_s29 }
 0x41b   : > { %v1018_v58 = vpop.permute.xlu1 %1017 }
 0x41e   : > { %1240 = vrot.lane.b32.xlu0 %v1984_v54, %s1721_s30 }
 0x41f   : > { %v1016_v60 = vpop.permute.xlu1 %1015 }
 0x420   : > { %v1022_v28 = vsel %vm1021_vm1, %v1016_v60, %v1018_v58 }
 0x422   : > { %1243 = vrot.lane.b32.xlu0 %v1984_v54, %s1722_s9  ;;  %s328_s9 = scalar_lea.vmem %s2094_s6, %s1660_s26 }
 0x423   : > { %v1000_v62 = vpop.permute.xlu1 %999 }
 0x426   : > { %1246 = vrot.lane.b32.xlu0 %v1984_v54, %s1723_s10  ;;  %s1456_s10 = sshll.u32 %s2106_s28, 2 }
 0x427   : > { %v998_v1 = vpop.permute.xlu1 %997  ;;  %s332_s13 = scalar_lea.vmem %s2095_s7, %s1456_s10  ;;  %s336_s16 = scalar_lea.vmem %s2096_s8, %s1456_s10 }
 0x428   : > { %v1004_v37 = vsel %vm949_vm14, %v998_v1, %v1000_v62 }
 0x42a   : > { %1249 = vrot.lane.b32.xlu0 %v1984_v54, %s1712_s17 }
 0x42b   : > { %v1045_v5 = vpop.permute.xlu1 %1044 }
 0x42c   : > { %v1049_v14 = vsel %vm1048_vm0, %v1043_v61, %v1045_v5 }
 0x42d   : > { %v1099_v22 = vsel %vm1060_vm2, %v1040_v19, %v1049_v14 }
 0x42e   : > { %1252 = vrot.lane.b32.xlu0 %v1984_v54, %s1725_s12 }
 0x42f   : > { %v1027_v10 = vpop.permute.xlu1 %1026 }
 0x430   : > { %v1031_v23 = vsel %vm947_vm13, %v1025_v63, %v1027_v10 }
 0x431   : > { %v1087_v30 = vsel %vm1060_vm2, %v1022_v28, %v1031_v23 }
 0x432   : > { %1258 = vrot.lane.b32.xlu0 %v1984_v54, %s1727_s14 }
 0x433   : > { %v1009_v13 = vpop.permute.xlu1 %1008 }
 0x434   : > { %v1013_v31 = vsel %vm1012_vm12, %v1007_v2, %v1009_v13 }
 0x435   : > { %v1075_v40 = vsel %vm1060_vm2, %v1004_v37, %v1013_v31 }
 0x437   : > { %v991_v21 = vpop.permute.xlu1 %990 }
 0x43b   : > { %v989_v33 = vpop.permute.xlu1 %988 }
 0x468   : > { %v1056_v4 = vpop.permute.xlu0 %1055 }
 0x469   : > { %v1059_v6 = vsel %vm945_vm11, %v1054_v55, %v1056_v4  ;;  %v1120_v7 = vsel %vm1060_vm2, %v1056_v4, 0 }
 0x46a   : > { %1499 = vmatprep.subr.msk.bf16.mxu1 %vm1060_vm2, %v1059_v6  ;;  %1647 = vmatpush3.bf16.msra.mxu0 %v1120_v7 }
 0x46b   : > { %1129 = vmatpush1.bf16.msra.mxu1 %v1114_v8  ;;  %1648 = vmatprep.subr.bf16.mxu0 %v1710_v0 }
 0x46c   : > { %v1038_v9 = vpop.permute.xlu0 %1037 }
 0x46d   : > { %v1041_v16 = vsel %vm1039_vm15, %v1036_v56, %v1038_v9  ;;  %vm994_vm15 = vcmask 1039360  }
 0x46e   : > { %v995_v41 = vsel %vm994_vm15, %v989_v33, %v991_v21 }
 0x46f   : > { %v1063_v48 = vsel %vm1060_vm2, %v1944_v38, %v995_v41 }
 0x470   : > { %v1020_v11 = vpop.permute.xlu0 %1019 }
 0x471   : > { %v1023_v25 = vsel %vm1021_vm1, %v1018_v58, %v1020_v11 }
 0x474   : > { %v1002_v12 = vpop.permute.xlu0 %1001 }
 0x475   : > { %v1005_v34 = vsel %vm949_vm14, %v1000_v62, %v1002_v12 }
 0x478   : > { %v1047_v15 = vpop.permute.xlu0 %1046 }
 0x479   : > { %v1050_v17 = vsel %vm1048_vm0, %v1045_v5, %v1047_v15  ;;  %v1107_v18 = vsel %vm1060_vm2, %v1038_v9, %v1047_v15 }
 0x47a   : > { %1649 = vmatpush3.bf16.msra.mxu0 %v1107_v18  ;;  %v1103_v20 = vsel %vm1060_vm2, %v1041_v16, %v1050_v17 }
 0x47b   : > { %1130 = vmatprep.subr.bf16.mxu1 %v1103_v20  ;;  %1650 = vmatprep.subr.bf16.mxu0 %v1710_v0 }
 0x47c   : > { %v1029_v24 = vpop.permute.xlu0 %1028  ;;  %1131 = vmatpush1.bf16.msra.mxu1 %v1099_v22 }
 0x47d   : > { %v1032_v26 = vsel %vm947_vm13, %v1027_v10, %v1029_v24  ;;  %v1095_v27 = vsel %vm1060_vm2, %v1020_v11, %v1029_v24 }
 0x47e   : > { %1651 = vmatpush3.bf16.msra.mxu0 %v1095_v27  ;;  %v1091_v29 = vsel %vm1060_vm2, %v1023_v25, %v1032_v26 }
 0x47f   : > { %1132 = vmatprep.subr.bf16.mxu1 %v1091_v29  ;;  %1652 = vmatprep.subr.bf16.mxu0 %v1710_v0 }
 0x480   : > { %v1011_v32 = vpop.permute.xlu0 %1010  ;;  %1133 = vmatpush1.bf16.msra.mxu1 %v1087_v30 }
 0x481   : > { %v1014_v35 = vsel %vm1012_vm12, %v1009_v13, %v1011_v32  ;;  %v1083_v36 = vsel %vm1060_vm2, %v1002_v12, %v1011_v32 }
 0x482   : > { %1653 = vmatpush3.bf16.msra.mxu0 %v1083_v36  ;;  %v1079_v39 = vsel %vm1060_vm2, %v1005_v34, %v1014_v35 }
 0x483   : > { %1134 = vmatprep.subr.bf16.mxu1 %v1079_v39  ;;  %1654 = vmatprep.subr.bf16.mxu0 %v1710_v0 }
 0x484   : > { %v993_v43 = vpop.permute.xlu0 %992  ;;  %1135 = vmatpush1.bf16.msra.mxu1 %v1075_v40 }
 0x485   : > { %v996_v44 = vsel %vm994_vm15, %v991_v21, %v993_v43  ;;  %v1071_v45 = vsel %vm1060_vm2, %v1971_v49, %v993_v43  ;;  %v1235_v49 = vpop.permute.xlu1 %1234 }
 0x486   : > { %1655 = vmatpush3.bf16.msra.mxu0 %v1071_v45  ;;  %v1067_v46 = vsel %vm1060_vm2, %v1950_v42, %v996_v44 }
 0x487   : > { %1136 = vmatprep.subr.bf16.mxu1 %v1067_v46 }
 0x488   : > { %1137 = vmatpush1.bf16.msra.mxu1 %v1063_v48  ;;  %v1217_v0 = vpop.permute.xlu0 %1216 }
 0x489   : > { %1657 = vmatmul.mubr.msk.bf16.vlgmr.msra.gmra.mxu0 %vm943_vm10, %v1109_v47  ;;  %v1220_v52 = vpop.permute.xlu1 %1219  ;;  %v1261_v57 = vsel %vm937_vm4, %v1984_v54, %v1217_v0  ;;  %vm2101_vm4 = vcmask 719872  }
 0x48a   : > { %v1262_v58 = vsel %vm939_vm3, %v1261_v57, %v1220_v52  ;;  %vm1208_vm3 = vcmask 257024  }
 0x48b   : > { %1500 = vmatmul.mubr.msk.bf16.vlgmr.msra.gmra.mxu1 %vm943_vm10, %v1109_v47 }
 0x48c   : > { %v1238_v50 = vpop.permute.xlu0 %1237 }
 0x48d   : > { %v1223_v53 = vpop.permute.xlu1 %1222  ;;  %v1268_v38 = vsel %vm951_vm5, %v1235_v49, %v1238_v50  ;;  %vm2102_vm5 = vcmask 113664  }
 0x48e   : > { %v1263_v62 = vsel %vm941_vm9, %v1262_v58, %v1223_v53 }
 0x490   : > { %v1241_v51 = vpop.permute.xlu0 %1240 }
 0x491   : > { %v1226_v56 = vpop.permute.xlu1 %1225  ;;  %v1269_v60 = vsel %vm953_vm6, %v1268_v38, %v1241_v51  ;;  %vm2103_vm6 = vcmask 867328  }
 0x492   : > { %v1264_v1 = vsel %vm943_vm10, %v1263_v62, %v1226_v56 }
 0x494   : > { %v1244_v42 = vpop.permute.xlu0 %1243 }
 0x495   : > { %v1229_v61 = vpop.permute.xlu1 %1228  ;;  %v1270_v63 = vsel %vm955_vm7, %v1269_v60, %v1244_v42  ;;  %vm2104_vm7 = vcmask 1014784  }
 0x496   : > { %v1265_v54 = vsel %vm945_vm11, %v1264_v1, %v1229_v61 }
 0x498   : > { %v1247_v55 = vpop.permute.xlu0 %1246 }
 0x499   : > { %v1271_v3 = vsel %vm957_vm8, %v1270_v63, %v1247_v55  ;;  %v1232_v4 = vpop.permute.xlu1 %1231  ;;  %vm1286_vm8 = vcmask 3072  }
 0x49a   : > { %v1266_v7 = vsel %vm947_vm13, %v1265_v54, %v1232_v4 }
 0x49b   : > { %v1267_v13 = vsel %vm949_vm14, %v1266_v7, %v1235_v49 }
 0x49c   : > { %v1250_v59 = vpop.permute.xlu0 %1249 }
 0x49d   : > { %v1272_v6 = vsel %vm2101_vm4, %v1271_v3, %v1250_v59  ;;  %v1256_v8 = vpop.permute.xlu1 %1255 }
 0x4a0   : > { %v1253_v2 = vpop.permute.xlu0 %1252 }
 0x4a1   : > { %v1273_v11 = vsel %vm2103_vm6, %v1272_v6, %v1253_v2 }
 0x4a2   : > { %v1274_v17 = vsel %vm2104_vm7, %v1273_v11, %v1256_v8 }
 0x4a4   : > { %v1259_v5 = vpop.permute.xlu0 %1258 }
 0x4a5   : > { %v1275_v9 = vsel %vm2102_vm5, %v1256_v8, %v1259_v5 }
 0x549   : > { %v1197_v10 = vpop.f32.mrf.mxu0 }
 0x54a   : > { %1209 = vst.msk [vmem:[%s328_s9 + $0x8] sm:$0xf] %vm1208_vm3, %v1197_v10  ;;  %v1278_v16 = vmul.f32 %v1275_v9, %v1197_v10 }
 0x54b   : > { %v1156_v12 = vpop.f32.mrf.mxu1  ;;  %v1658_v14 = vpop.f32.mrf.mxu0 }
 0x54c   : > { %v1276_v15 = vmul.f32 %v1267_v13, %v1156_v12  ;;  %v1290_v28 = vmul.f32 %v1278_v16, %v1278_v16  ;;  %v1282_v31 = vsel %vm1208_vm3, %v1278_v16, 0.0 }
 0x54d   : > { %v1158_v18 = vpop.f32.mrf.mxu1  ;;  %v1200_v19 = vpop.f32.mrf.mxu0 }
 0x54e   : > { %v1288_v20 = vmul.f32 %v1276_v15, %v1276_v15  ;;  %v1205_v21 = vcombine.low %v1156_v12, %v1158_v18  ;;  %v1277_v22 = vmul.f32 %v1274_v17, %v1158_v18  ;;  %v1279_v25 = vsel %vm1060_vm2, %v1276_v15, 0.0 }
 0x54f   : > { %v1160_v23 = vpop.f32.mrf.mxu1  ;;  %v1659_v24 = vpop.f32.mrf.mxu0  ;;  %v1294_v36 = vsel %vm1208_vm3, %v1290_v28, 0.0 }
 0x550   : > { %1207 = vst [vmem:[%s328_s9] sm:$0xff] %v1205_v21  ;;  %v1280_v26 = vsel %vm1060_vm2, %v1277_v22, 0.0  ;;  %v1289_v27 = vmul.f32 %v1277_v22, %v1277_v22  ;;  %v1291_v32 = vsel %vm1060_vm2, %v1288_v20, 0.0 }
 0x551   : > { %v1281_v29 = vadd.f32 %v1280_v26, %v1279_v25  ;;  %v1161_v30 = vpop.f32.mrf.mxu1 }
 0x552   : > { %v1292_v33 = vsel %vm1060_vm2, %v1289_v27, 0.0 }
 0x553   : > { %v1283_v34 = vadd.f32 %v1282_v31, %v1281_v29  ;;  %v1293_v35 = vadd.f32 %v1292_v33, %v1291_v32 }
 0x555   : > { %1284 = vadd.xlane.f32.xlu1 %v1283_v34  ;;  %v1295_v37 = vadd.f32 %v1294_v36, %v1293_v35 }
 0x557   : > { %1296 = vadd.xlane.f32.xlu0 %v1295_v37 }
 0x5de   : > { %v1285_v39 = vpop.xlane.xlu1 %1284 }
 0x5df   : > { %1287 = vst.msk [vmem:[%s332_s13] sm:$0xf] %vm1286_vm8, %v1285_v39 }
 0x5e0   : > { %v1297_v40 = vpop.xlane.xlu0 %1296 }
 0x5e1   : > { %1298 = vst.msk [vmem:[%s336_s16] sm:$0xf] %vm1286_vm8, %v1297_v40 }
 0x5e2 PF: > { %s19_s27 = sadd.s32 1, %s1708_s27  }
 0x5e3   : > { %p16_p4 = scmp.ge.s32.totalorder %s19_s27, 4  }
 0x5e5   :  { %18 = sbr.rel (!%p16_p4) target bundleno = 1 (0x1), region = 106 }

</bundles_post_ra>
